<compile_context>
chip_gen: v7x
topology: tpu7x:2x2x1
jax: 0.10.0
libtpu: 0.0.40
codegen_flags: <defaults>
</compile_context>

<pallas_src>
import functools

import numpy as np
import jax
import jax.numpy as jnp
from jax import lax
from jax.experimental import pallas as pl
from jax.experimental.pallas import tpu as pltpu


# ----------------------------------------------------------------------------- helpers

def _layernorm(x, g, b, eps):
    # PyTorch LayerNorm: biased variance, eps inside sqrt.
    mu = jnp.mean(x, axis=-1, keepdims=True)
    var = jnp.mean(jnp.square(x - mu), axis=-1, keepdims=True)
    return (x - mu) * lax.rsqrt(var + eps) * g + b


def _erf_approx(x):
    # Abramowitz & Stegun 7.1.26 polynomial erf (max abs err ~1.5e-7) -> keeps exact-GELU
    # semantics of nn.GELU() to ~1e-7 without relying on a lax.erf Mosaic lowering.
    a1, a2, a3, a4, a5 = 0.254829592, -0.284496736, 1.421413741, -1.453152027, 1.061405429
    p = 0.3275911
    s = jnp.sign(x)
    z = jnp.abs(x)
    t = 1.0 / (1.0 + p * z)
    poly = ((((a5 * t + a4) * t + a3) * t + a2) * t + a1) * t
    return s * (1.0 - poly * jnp.exp(-z * z))


def _gelu_exact(x):
    return 0.5 * x * (1.0 + _erf_approx(x * np.float32(1.0 / np.sqrt(2.0))))


def patchify(imgs, patch):
    # (B, C, H, W) -> (B, N, C*p*p); per-patch vector order (c, ph, pw) matches the flattened
    # Conv2d weight, and patch order (row-major) matches flatten(2).transpose(1, 2).
    B, C, H, W = imgs.shape
    hp, wp = H // patch, W // patch
    x = imgs.reshape(B, C, hp, patch, wp, patch)
    x = x.transpose(0, 2, 4, 1, 3, 5)
    return x.reshape(B, hp * wp, C * patch * patch)


def _pick_block_b(B, S, D, budget=4 << 20):
    # Largest batch-block that (a) divides B, (b) keeps the (BT*S, D) block shape legal
    # (second-to-last block dim multiple of 8 unless it equals the full dim), (c) fits budget.
    legal = [d for d in range(1, B + 1) if B % d == 0 and (d == B or (d * S) % 8 == 0)]
    fits = [d for d in legal if d * S * D * 4 <= budget]
    return max(fits) if fits else min(legal)


def _block_vmem_limit(rows, D, Dh, itemsize=4):
    # Explicit scoped-VMEM sizing: x in/out (double-buffered) + resident weights + scratch +
    # live intermediates + headroom.  Clamped to stay valid on v7x (64 MiB per TC).
    x_io = 2 * 2 * rows * D * itemsize
    weights = (D * 3 * D + 3 * D + D * D + D + D * Dh + Dh + Dh * D + D + 6 * D) * itemsize
    scratch = rows * (3 * D + D) * itemsize
    acts = rows * (3 * D + Dh + 4 * D) * itemsize
    total = x_io + 2 * weights + scratch + 2 * acts + (8 << 20)
    return int(min(max(total, 16 << 20), 64 << 20))


# ----------------------------------------------------------------------------- kernels

def _patch_embed_kernel(patches_ref, w_ref, b_ref, pe_ref, cls_ref, out_ref, *, bt, mxu_dtype):
    n = pe_ref.shape[0]
    w = w_ref[...].astype(mxu_dtype)
    bias_pe = b_ref[...] + pe_ref[...]
    for b in range(bt):                                               # static unroll over images
        p = patches_ref[b].astype(mxu_dtype)                          # (N, Dp)
        y = jnp.dot(p, w, preferred_element_type=jnp.float32)         # (N, D)
        out_ref[b, pl.ds(0, 1), :] = cls_ref[...]                     # cls token row (row 0)
        out_ref[b, pl.ds(1, n), :] = y + bias_pe


def _vit_block_kernel(x_ref, ln1g, ln1b, wqkv, bqkv, wo, bo,
                      ln2g, ln2b, w1, b1, w2, b2, out_ref,
                      qkv_buf, attn_buf,
                      *, n_heads, scale, eps, bt, seq, mxu_dtype):
    D = x_ref.shape[-1]
    Hd = D // n_heads
    x = x_ref[...]                                                    # (bt*seq, D)

    # --- attention branch: x + Wo(MHA(LN(x))) -------------------------------------------------
    xn = _layernorm(x, ln1g[...], ln1b[...], eps)
    # fused Q/K/V projection: one wide (R, D) x (D, 3D) matmul.
    qkv = jnp.dot(xn.astype(mxu_dtype), wqkv[...].astype(mxu_dtype),
                  preferred_element_type=jnp.float32) + bqkv[...]
    qkv_buf[...] = qkv                                                # stage in VMEM, read per-head slices

    for b in range(bt):                                               # static unroll over images
        r0 = b * seq
        for h in range(n_heads):                                      # static unroll over heads
            c0 = h * Hd
            # fold the softmax scale into Q (S, Hd) instead of scaling the (S, S) scores
            qh = qkv_buf[r0:r0 + seq, c0:c0 + Hd] * scale
            kh = qkv_buf[r0:r0 + seq, D + c0:D + c0 + Hd]
            vh = qkv_buf[r0:r0 + seq, 2 * D + c0:2 * D + c0 + Hd]
            s = lax.dot_general(qh.astype(mxu_dtype), kh.astype(mxu_dtype),
                                (((1,), (1,)), ((), ())),
                                preferred_element_type=jnp.float32)   # (S, S)
            m = jnp.max(s, axis=-1, keepdims=True)
            e = jnp.exp(s - m)
            # reciprocal of the (S, 1) row sums + (S, S) multiply instead of an (S, S) divide.
            p = e * pl.reciprocal(jnp.sum(e, axis=-1, keepdims=True))
            oh = jnp.dot(p.astype(mxu_dtype), vh.astype(mxu_dtype),
                         preferred_element_type=jnp.float32)          # (S, Hd)
            attn_buf[r0:r0 + seq, c0:c0 + Hd] = oh                    # lay heads out as (S, n_heads*Hd)

    # single (R, D) x (D, D) output projection (accumulation stays in the MXU, not the VALU).
    attn = attn_buf[...]
    x = x + jnp.dot(attn.astype(mxu_dtype), wo[...].astype(mxu_dtype),
                    preferred_element_type=jnp.float32) + bo[...]

    # --- MLP branch: x + MLP(LN(x)) ------------------------------------------------------------
    xn2 = _layernorm(x, ln2g[...], ln2b[...], eps)
    h1 = jnp.dot(xn2.astype(mxu_dtype), w1[...].astype(mxu_dtype),
                 preferred_element_type=jnp.float32) + b1[...]
    h1 = _gelu_exact(h1)
    y = jnp.dot(h1.astype(mxu_dtype), w2[...].astype(mxu_dtype),
                preferred_element_type=jnp.float32) + b2[...]
    out_ref[...] = x + y


def _final_ln_kernel(x_ref, g_ref, b_ref, out_ref, *, eps):
    out_ref[...] = _layernorm(x_ref[...], g_ref[...], b_ref[...], eps)


# ----------------------------------------------------------------------------- wrappers

def patch_embed_call(patches, w, b, pe, cls, *, block_b, mxu_dtype=jnp.float32):
    B, N, Dp = patches.shape
    D = w.shape[1]
    kern = functools.partial(_patch_embed_kernel, bt=block_b, mxu_dtype=mxu_dtype)
    return pl.pallas_call(
        kern,
        out_shape=jax.ShapeDtypeStruct((B, N + 1, D), jnp.float32),
        grid=(B // block_b,),
        in_specs=[
            pl.BlockSpec((block_b, N, Dp), lambda i: (i, 0, 0)),
            pl.BlockSpec((Dp, D), lambda i: (0, 0)),
            pl.BlockSpec((1, D), lambda i: (0, 0)),
            pl.BlockSpec((N, D), lambda i: (0, 0)),
            pl.BlockSpec((1, D), lambda i: (0, 0)),
        ],
        out_specs=pl.BlockSpec((block_b, N + 1, D), lambda i: (i, 0, 0)),
        compiler_params=pltpu.CompilerParams(dimension_semantics=("parallel",)),
    )(patches, w, b, pe, cls)


def vit_block_call(x2, lp, *, n_heads, scale, eps, batch, seq, block_b, mxu_dtype=jnp.float32):
    R, D = x2.shape
    Dh = lp["w1"].shape[1]
    rows = block_b * seq

    def full(shape):
        nd = len(shape)
        return pl.BlockSpec(shape, lambda i, _nd=nd: (0,) * _nd)

    in_specs = [
        pl.BlockSpec((rows, D), lambda i: (i, 0)),        # x block (block_b images worth of rows)
        full((1, D)), full((1, D)),                       # ln1 gamma/beta
        full((D, 3 * D)), full((1, 3 * D)),               # packed qkv projection
        full((D, D)), full((1, D)),                       # packed output projection
        full((1, D)), full((1, D)),                       # ln2 gamma/beta
        full((D, Dh)), full((1, Dh)),                     # mlp linear1
        full((Dh, D)), full((1, D)),                      # mlp linear2
    ]
    kern = functools.partial(_vit_block_kernel, n_heads=n_heads, scale=scale, eps=eps,
                             bt=block_b, seq=seq, mxu_dtype=mxu_dtype)
    args = (x2, lp["ln1g"], lp["ln1b"], lp["wqkv"], lp["bqkv"], lp["wo"], lp["bo"],
            lp["ln2g"], lp["ln2b"], lp["w1"], lp["b1"], lp["w2"], lp["b2"])
    return pl.pallas_call(
        kern,
        out_shape=jax.ShapeDtypeStruct((R, D), jnp.float32),
        grid=(batch // block_b,),
        in_specs=in_specs,
        out_specs=pl.BlockSpec((rows, D), lambda i: (i, 0)),
        scratch_shapes=[
            pltpu.VMEM((rows, 3 * D), jnp.float32),       # staged fused-QKV result
            pltpu.VMEM((rows, D), jnp.float32),           # assembled per-head attention output
        ],
        input_output_aliases={0: 0},                      # x in / x out share a buffer
        compiler_params=pltpu.CompilerParams(
            dimension_semantics=("parallel",),
            vmem_limit_bytes=_block_vmem_limit(rows, D, Dh)),
    )(*args)


def final_ln_call(x, g, b, eps):
    kern = functools.partial(_final_ln_kernel, eps=eps)
    return pl.pallas_call(
        kern, out_shape=jax.ShapeDtypeStruct(x.shape, jnp.float32)
    )(x, g, b)


def vit_forward(imgs, params, *, patch_size, n_heads, eps=1e-6, mxu_dtype=jnp.float32):
    # NOTE: pass mxu_dtype=jnp.bfloat16 on v6e/v7x for ~2x MXU throughput and half the weight
    #       traffic (LayerNorm/softmax/residuals stay f32); kept f32 here for the exact check.
    B = imgs.shape[0]
    N, D = params["pe"].shape
    S = N + 1
    patches = patchify(imgs, patch_size)                                  # glue (free-ish reshape/transpose)
    bt_pe = _pick_block_b(B, N, max(patches.shape[-1], D))
    tokens = patch_embed_call(patches, params["patch_w"], params["patch_b"],
                              params["pe"], params["cls"], block_b=bt_pe,
                              mxu_dtype=mxu_dtype)                        # (B, S, D) incl. cls row
    x = tokens.reshape(B * S, D)                                          # lane-dense 2-D token slab
    scale = float((D // n_heads) ** (-0.5))
    bt = _pick_block_b(B, S, D)
    for lp in params["layers"]:
        x = vit_block_call(x, lp, n_heads=n_heads, scale=scale, eps=eps,
                           batch=B, seq=S, block_b=bt, mxu_dtype=mxu_dtype)
    cls_tokens = x.reshape(B, S, D)[:, 0, :]                              # pool_type == 'cls_token'
    return final_ln_call(cls_tokens, params["norm_g"], params["norm_b"], eps)


# ----------------------------------------------------------------------------- reference (pure JAX)

def vit_reference(imgs, params, *, patch_size, n_heads, eps=1e-6):
    patches = patchify(imgs, patch_size)
    x = patches @ params["patch_w"] + params["patch_b"] + params["pe"]
    B, N, D = x.shape
    x = jnp.concatenate([jnp.broadcast_to(params["cls"][None], (B, 1, D)), x], axis=1)
    S = N + 1
    Hd = D // n_heads
    scale = Hd ** (-0.5)
    for lp in params["layers"]:
        xn = _layernorm(x, lp["ln1g"], lp["ln1b"], eps)
        qkv = xn @ lp["wqkv"] + lp["bqkv"]
        q, k, v = qkv[..., :D], qkv[..., D:2 * D], qkv[..., 2 * D:]
        q = q.reshape(B, S, n_heads, Hd)
        k = k.reshape(B, S, n_heads, Hd)
        v = v.reshape(B, S, n_heads, Hd)
        s = jnp.einsum("bqhd,bkhd->bhqk", q, k) * scale
        p = jax.nn.softmax(s, axis=-1)
        o = jnp.einsum("bhqk,bkhd->bqhd", p, v).reshape(B, S, D)
        x = x + o @ lp["wo"] + lp["bo"]
        xn2 = _layernorm(x, lp["ln2g"], lp["ln2b"], eps)
        h1 = xn2 @ lp["w1"] + lp["b1"]
        h1 = 0.5 * h1 * (1.0 + jax.scipy.special.erf(h1 / jnp.sqrt(2.0)))   # exact GELU
        x = x + h1 @ lp["w2"] + lp["b2"]
    return _layernorm(x[:, 0], params["norm_g"], params["norm_b"], eps)


# ----------------------------------------------------------------------------- params

def init_params(key, *, d_model, depth, n_heads, patch_size, img_size, in_chans=3, mlp_ratio=4.0):
    Dh = int(d_model * mlp_ratio)
    Dp = in_chans * patch_size * patch_size
    N = (img_size // patch_size) ** 2
    keys = iter(jax.random.split(key, 8 + depth * 10))

    def rnd(shape, s):
        return jax.random.normal(next(keys), shape, jnp.float32) * s

    # Conv2d(3, D, p, p) expressed as a (C*p*p, D) matmul weight; q/k/v packed as one (D, 3D)
    # weight (column order q|k|v, each ordered (head, head_dim) exactly like nn.Linear(D, D)).
    params = dict(
        patch_w=rnd((Dp, d_model), 0.05),
        patch_b=rnd((1, d_model), 0.02),
        pe=rnd((N, d_model), 0.02),                       # nn.init.normal_(pe, 0, 0.02)
        cls=jnp.zeros((1, d_model), jnp.float32),         # cls_token init zeros
        norm_g=jnp.ones((1, d_model), jnp.float32),
        norm_b=jnp.zeros((1, d_model), jnp.float32),
        layers=[],
    )
    for _ in range(depth):
        layer = dict(
            ln1g=jnp.ones((1, d_model), jnp.float32), ln1b=jnp.zeros((1, d_model), jnp.float32),
            wqkv=rnd((d_model, 3 * d_model), 0.05), bqkv=rnd((1, 3 * d_model), 0.02),
            wo=rnd((d_model, d_model), 0.05), bo=rnd((1, d_model), 0.02),
            ln2g=jnp.ones((1, d_model), jnp.float32), ln2b=jnp.zeros((1, d_model), jnp.float32),
            w1=rnd((d_model, Dh), 0.05), b1=rnd((1, Dh), 0.02),
            w2=rnd((Dh, d_model), 0.05), b2=rnd((1, d_model), 0.02),
        )
        params["layers"].append(layer)
    return params


# ----------------------------------------------------------------------------- main

if __name__ == "__main__":
    B, C, IMG, PATCH = 2, 3, 16, 4
    D_MODEL, DEPTH, N_HEADS = 32, 2, 2
    EPS = 1e-6

    root = jax.random.PRNGKey(0)
    k_img, k_par = jax.random.split(root)
    imgs = jax.random.normal(k_img, (B, C, IMG, IMG), jnp.float32)
    params = init_params(k_par, d_model=D_MODEL, depth=DEPTH, n_heads=N_HEADS,
                         patch_size=PATCH, img_size=IMG)

    out = vit_forward(imgs, params, patch_size=PATCH, n_heads=N_HEADS, eps=EPS)
    out = jax.block_until_ready(out)

    ref = vit_reference(imgs, params, patch_size=PATCH, n_heads=N_HEADS, eps=EPS)
    ref = jax.block_until_ready(ref)

    assert out.shape == (B, D_MODEL), out.shape
    err = np.max(np.abs(np.asarray(out) - np.asarray(ref)))
    assert np.allclose(np.asarray(out), np.asarray(ref), rtol=1e-4, atol=1e-4), err
    print("KERNEL_OK")
</pallas_src>

<mosaic_0001>
module attributes {stable_mosaic.version = 11 : i64} {
  func.func @_patch_embed_kernel(%arg0: i32, %arg1: memref<2x16x48xf32, #tpu.memory_space<vmem>>, %arg2: memref<48x32xf32, #tpu.memory_space<vmem>>, %arg3: memref<1x32xf32, #tpu.memory_space<vmem>>, %arg4: memref<16x32xf32, #tpu.memory_space<vmem>>, %arg5: memref<1x32xf32, #tpu.memory_space<vmem>>, %arg6: memref<2x17x32xf32, #tpu.memory_space<vmem>>) attributes {dimension_semantics = [#tpu.dimension_semantics<parallel>], iteration_bounds = array<i64: 1>, scalar_prefetch = 0 : i64, scratch_operands = 0 : i64, tpu.core_type = #tpu.core_type<tc>, window_params = [{transform_indices = @transform_0, window_bounds = array<i64: 2, 16, 48>}, {pipeline_mode = #tpu.pipeline_mode<synchronous>, transform_indices = @transform_1, window_bounds = array<i64: 48, 32>}, {pipeline_mode = #tpu.pipeline_mode<synchronous>, transform_indices = @transform_2, window_bounds = array<i64: 1, 32>}, {pipeline_mode = #tpu.pipeline_mode<synchronous>, transform_indices = @transform_3, window_bounds = array<i64: 16, 32>}, {pipeline_mode = #tpu.pipeline_mode<synchronous>, transform_indices = @transform_4, window_bounds = array<i64: 1, 32>}, {transform_indices = @transform_5, window_bounds = array<i64: 2, 17, 32>}]} {
    %c0 = arith.constant 0 : index
    %c0_0 = arith.constant 0 : index
    %0 = vector.load %arg2[%c0, %c0_0] : memref<48x32xf32, #tpu.memory_space<vmem>>, vector<48x32xf32>
    %c0_1 = arith.constant 0 : index
    %c0_2 = arith.constant 0 : index
    %1 = vector.load %arg3[%c0_1, %c0_2] : memref<1x32xf32, #tpu.memory_space<vmem>>, vector<1x32xf32>
    %c0_3 = arith.constant 0 : index
    %c0_4 = arith.constant 0 : index
    %2 = vector.load %arg4[%c0_3, %c0_4] : memref<16x32xf32, #tpu.memory_space<vmem>>, vector<16x32xf32>
    %3 = vector.broadcast %1 : vector<1x32xf32> to vector<16x32xf32>
    %4 = arith.addf %3, %2 : vector<16x32xf32>
    %c0_5 = arith.constant 0 : index
    %c0_6 = arith.constant 0 : index
    %c0_7 = arith.constant 0 : index
    %5 = vector.load %arg1[%c0_5, %c0_6, %c0_7] : memref<2x16x48xf32, #tpu.memory_space<vmem>>, vector<1x16x48xf32>
    %6 = vector.shape_cast %5 : vector<1x16x48xf32> to vector<16x48xf32>
    %cst = arith.constant dense<0.000000e+00> : vector<16x32xf32>
    %7 = tpu.matmul %6, %0, %cst {dimension_numbers = #tpu.dot_dimension_numbers<[1], [0], [0], [1], [0, 0, 1, 1], [], []>} : vector<16x48xf32>, vector<48x32xf32>, vector<16x32xf32> -> vector<16x32xf32>
    %c0_8 = arith.constant 0 : index
    %c0_9 = arith.constant 0 : index
    %8 = vector.load %arg5[%c0_8, %c0_9] : memref<1x32xf32, #tpu.memory_space<vmem>>, vector<1x32xf32>
    %c0_10 = arith.constant 0 : index
    %c0_11 = arith.constant 0 : index
    %c0_12 = arith.constant 0 : index
    %9 = vector.load %arg6[%c0_10, %c0_11, %c0_12] : memref<2x17x32xf32, #tpu.memory_space<vmem>>, vector<1x1x32xf32>
    %10 = vector.shape_cast %9 : vector<1x1x32xf32> to vector<1x32xf32>
    %11 = vector.shape_cast %8 : vector<1x32xf32> to vector<1x1x32xf32>
    tpu.vector_store %arg6[%c0_10, %c0_11, %c0_12], %11 {strides = array<i32>} : memref<2x17x32xf32, #tpu.memory_space<vmem>>, vector<1x1x32xf32>,
    %12 = arith.addf %7, %4 : vector<16x32xf32>
    %c0_13 = arith.constant 0 : index
    %c1 = arith.constant 1 : index
    %c0_14 = arith.constant 0 : index
    %13 = vector.load %arg6[%c0_13, %c1, %c0_14] : memref<2x17x32xf32, #tpu.memory_space<vmem>>, vector<1x16x32xf32>
    %14 = vector.shape_cast %13 : vector<1x16x32xf32> to vector<16x32xf32>
    %15 = vector.shape_cast %12 : vector<16x32xf32> to vector<1x16x32xf32>
    tpu.vector_store %arg6[%c0_13, %c1, %c0_14], %15 {strides = array<i32>} : memref<2x17x32xf32, #tpu.memory_space<vmem>>, vector<1x16x32xf32>,
    %c1_15 = arith.constant 1 : index
    %c0_16 = arith.constant 0 : index
    %c0_17 = arith.constant 0 : index
    %16 = vector.load %arg1[%c1_15, %c0_16, %c0_17] : memref<2x16x48xf32, #tpu.memory_space<vmem>>, vector<1x16x48xf32>
    %17 = vector.shape_cast %16 : vector<1x16x48xf32> to vector<16x48xf32>
    %cst_18 = arith.constant dense<0.000000e+00> : vector<16x32xf32>
    %18 = tpu.matmul %17, %0, %cst_18 {dimension_numbers = #tpu.dot_dimension_numbers<[1], [0], [0], [1], [0, 0, 1, 1], [], []>} : vector<16x48xf32>, vector<48x32xf32>, vector<16x32xf32> -> vector<16x32xf32>
    %c0_19 = arith.constant 0 : index
    %c0_20 = arith.constant 0 : index
    %19 = vector.load %arg5[%c0_19, %c0_20] : memref<1x32xf32, #tpu.memory_space<vmem>>, vector<1x32xf32>
    %c1_21 = arith.constant 1 : index
    %c0_22 = arith.constant 0 : index
    %c0_23 = arith.constant 0 : index
    %20 = vector.load %arg6[%c1_21, %c0_22, %c0_23] : memref<2x17x32xf32, #tpu.memory_space<vmem>>, vector<1x1x32xf32>
    %21 = vector.shape_cast %20 : vector<1x1x32xf32> to vector<1x32xf32>
    %22 = vector.shape_cast %19 : vector<1x32xf32> to vector<1x1x32xf32>
    tpu.vector_store %arg6[%c1_21, %c0_22, %c0_23], %22 {strides = array<i32>} : memref<2x17x32xf32, #tpu.memory_space<vmem>>, vector<1x1x32xf32>,
    %23 = arith.addf %18, %4 : vector<16x32xf32>
    %c1_24 = arith.constant 1 : index
    %c1_25 = arith.constant 1 : index
    %c0_26 = arith.constant 0 : index
    %24 = vector.load %arg6[%c1_24, %c1_25, %c0_26] : memref<2x17x32xf32, #tpu.memory_space<vmem>>, vector<1x16x32xf32>
    %25 = vector.shape_cast %24 : vector<1x16x32xf32> to vector<16x32xf32>
    %26 = vector.shape_cast %23 : vector<16x32xf32> to vector<1x16x32xf32>
    tpu.vector_store %arg6[%c1_24, %c1_25, %c0_26], %26 {strides = array<i32>} : memref<2x17x32xf32, #tpu.memory_space<vmem>>, vector<1x16x32xf32>,
    return
  }
  func.func @transform_0(%arg0: i32) -> (i32, i32, i32) {
    %c0_i32 = arith.constant 0 : i32
    %c0_i32_0 = arith.constant 0 : i32
    %c0_i32_1 = arith.constant 0 : i32
    return %arg0, %c0_i32, %c0_i32_0 : i32, i32, i32
  }
  func.func @transform_1(%arg0: i32) -> (i32, i32) {
    %c0_i32 = arith.constant 0 : i32
    %c0_i32_0 = arith.constant 0 : i32
    %c0_i32_1 = arith.constant 0 : i32
    return %c0_i32, %c0_i32_0 : i32, i32
  }
  func.func @transform_2(%arg0: i32) -> (i32, i32) {
    %c0_i32 = arith.constant 0 : i32
    %c0_i32_0 = arith.constant 0 : i32
    %c0_i32_1 = arith.constant 0 : i32
    return %c0_i32, %c0_i32_0 : i32, i32
  }
  func.func @transform_3(%arg0: i32) -> (i32, i32) {
    %c0_i32 = arith.constant 0 : i32
    %c0_i32_0 = arith.constant 0 : i32
    %c0_i32_1 = arith.constant 0 : i32
    return %c0_i32, %c0_i32_0 : i32, i32
  }
  func.func @transform_4(%arg0: i32) -> (i32, i32) {
    %c0_i32 = arith.constant 0 : i32
    %c0_i32_0 = arith.constant 0 : i32
    %c0_i32_1 = arith.constant 0 : i32
    return %c0_i32, %c0_i32_0 : i32, i32
  }
  func.func @transform_5(%arg0: i32) -> (i32, i32, i32) {
    %c0_i32 = arith.constant 0 : i32
    %c0_i32_0 = arith.constant 0 : i32
    %c0_i32_1 = arith.constant 0 : i32
    return %arg0, %c0_i32, %c0_i32_0 : i32, i32, i32
  }
}

</mosaic_0001>

<bundles_post_ra>
// kernel: tpu_custom_call.1
= control target key start
LH: loop header
LB: loop body
LE: loop exit
PB: predicated region body
PF: predicated region fallthrough
CT: control target
= control target key end

     0   :  { %vm40_vm0 = vcmask 253952   ;;  %vm42_vm1 = vcmask 392192   ;;  %vm124_vm2 = vcmask 261120   ;;  %s399_s1 = inlined_call_operand.vmem [shape: f32[48,32], index: 1, kind: input, shape index: {}]   ;;  %s400_s0 = inlined_call_operand.vmem [shape: f32[2,16,48], index: 0, kind: input, shape index: {}]   ;;  %s401_s4 = inlined_call_operand.vmem [shape: f32[1,32], index: 4, kind: input, shape index: {}]   ;;  %s402_s5 = inlined_call_operand.vmem [shape: f32[2,17,32], index: 5, kind: output, shape index: {}]   ;;  %s403_s2 = inlined_call_operand.vmem [shape: f32[1,32], index: 2, kind: input, shape index: {}]   ;;  %s404_s3 = inlined_call_operand.vmem [shape: f32[16,32], index: 3, kind: input, shape index: {}]  }
   0x1   :  { %v20_v0 = vld [vmem:[%s399_s1] sm:$0xff]  ;;  %v21_v1 = vld [vmem:[%s399_s1 + $0x8] sm:$0xff]  ;;  %v22_v2 = vld [vmem:[%s399_s1 + $0x10] sm:$0xff] }
   0x2   :  { %v276_v3 = vpack.c.bf16 %v21_v1, %v20_v0  ;;  %v23_v4 = vld [vmem:[%s399_s1 + $0x18] sm:$0xff]  ;;  %v24_v6 = vld [vmem:[%s399_s1 + $0x20] sm:$0xff]  ;;  %v25_v7 = vld [vmem:[%s399_s1 + $0x28] sm:$0xff] }
   0x3   :  { %v280_v5 = vpack.c.bf16 %v23_v4, %v22_v2  ;;  %v37_v8 = vld [vmem:[%s400_s0] sm:$0xff]  ;;  %v223_v9 = vld [vmem:[%s400_s0 + $0x10] sm:$0xff]  ;;  %v284_v11 = vpack.c.bf16 %v25_v7, %v24_v6  ;;  %v38_v12 = vld [vmem:[%s400_s0 + $0x8] sm:$0xff] }
   0x4   :  { %277 = vmatprep.subr.bf16.mxu0 %v276_v3  ;;  %289 = vmatprep.subr.bf16.mxu1 %v276_v3  ;;  %v39_v10 = vld [vmem:[%s401_s4] sm:$0x1]  ;;  %v224_v13 = vld [vmem:[%s400_s0 + $0x18] sm:$0xff]  ;;  %v28_v16 = vld [vmem:[%s404_s3 + $0x8] sm:$0xff] }
   0x5   :  { %279 = vmatpush3.bf16.msra.mxu0 %v276_v3  ;;  %291 = vmatpush3.bf16.msra.mxu1 %v276_v3  ;;  %41 = vst.msk [vmem:[%s402_s5] sm:$0x1] %vm40_vm0, %v39_v10  ;;  %v130_v14 = vld [vmem:[%s401_s4] sm:$0x1] }
   0x6   :  { %281 = vmatprep.subr.bf16.mxu0 %v280_v5  ;;  %293 = vmatprep.subr.bf16.mxu1 %v280_v5  ;;  %225 = vst.msk [vmem:[%s402_s5 + $0x18] sm:$0x1] %vm40_vm0, %v130_v14  ;;  %v220_v15 = vld [vmem:[%s403_s2] ss:$0 sm:$0xff] }
   0x7   :  { %258 = vmatprep.mubr.msk.f32.mxu0 %vm42_vm1, %v37_v8  ;;  %273 = vmatprep.mubr.msk.f32.mxu1 %vm42_vm1, %v223_v9  ;;  %v27_v17 = vld [vmem:[%s404_s3] sm:$0xff]  ;;  %v36_v18 = vadd.f32 %v220_v15, %v28_v16 }
   0x8   :  { %v35_v19 = vadd.f32 %v220_v15, %v27_v17 }
   0x9   :  { %283 = vmatpush3.bf16.msra.mxu0 %v280_v5  ;;  %295 = vmatpush3.bf16.msra.mxu1 %v280_v5 }
   0xa   :  { %285 = vmatprep.subr.bf16.mxu0 %v284_v11  ;;  %297 = vmatprep.subr.bf16.mxu1 %v284_v11 }
   0xd   :  { %287 = vmatpush3.bf16.msra.mxu0 %v284_v11  ;;  %299 = vmatpush3.bf16.msra.mxu1 %v284_v11 }
  0x10   :  { %259 = vmatmul.mubr.msk.f32.vlgmr.msra.gmra.mrb[0].mxu0 %vm42_vm1, %v38_v12  ;;  %274 = vmatmul.mubr.msk.f32.vlgmr.msra.gmra.mrb[0].mxu1 %vm42_vm1, %v224_v13 }
  0xe3   :  { %v260_v20 = vpop.f32.mrb[0].mxu0  ;;  %v275_v21 = vpop.f32.mrb[0].mxu1 }
  0xe4   :  { %v121_v22 = vadd.f32 %v260_v20, %v36_v18  ;;  %v211_v23 = vadd.f32 %v275_v21, %v36_v18  ;;  %v115_v24 = vpop.f32.mrb[1].mxu0  ;;  %v205_v25 = vpop.f32.mrb[1].mxu1 }
  0xe5   :  { %v116_v26 = vadd.f32 %v115_v24, %v35_v19  ;;  %v206_v27 = vadd.f32 %v205_v25, %v35_v19 }
  0xe6   :  { %126 = vst.msk [vmem:[%s402_s5 + $0x9] sm:$0xff] %vm124_vm2, %v121_v22  ;;  %229 = vst.msk [vmem:[%s402_s5 + $0x21] sm:$0xff] %vm124_vm2, %v211_v23 }
  0xe7   :  { %125 = vst.msk [vmem:[%s402_s5 + $0x1] sm:$0xff] %vm124_vm2, %v116_v26  ;;  %228 = vst.msk [vmem:[%s402_s5 + $0x19] sm:$0xff] %vm124_vm2, %v206_v27 }

</bundles_post_ra>
